<compile_context>
chip_gen: v7x
topology: tpu7x:2x2x1
jax: 0.10.0
libtpu: 0.0.40
codegen_flags: <defaults>
</compile_context>

<pallas_src>
import jax
import jax.numpy as jnp
import numpy as np
from jax import lax
from jax.experimental import pallas as pl
from jax.experimental.pallas import tpu as pltpu

# ----- static configuration: UnetTMO.first_conv -----
N, C_IN, H, W = 2, 3, 16, 16
C_OUT, C_EXP, K = 3, 6, 3
HW = H * W                       # 256 -> lane dimension (multiple of 128)
NEG_SLOPE = 0.01                 # nn.LeakyReLU default negative_slope

CI, CE, CO = N * C_IN, N * C_EXP, N * C_OUT        # batch stacked on sublanes


def _rup8(v):
    return (v + 7) // 8 * 8


CI_P, CE_P, CO_P = _rup8(CI), _rup8(CE), _rup8(CO)   # 8, 16, 8 (sublane-padded)
SLAB_R, SLAB_C = max(CE_P, 8), 128                   # packed-weight slab shape

# static column offsets inside the packed weight slab
COL_W1, COL_B1, COL_BDW, COL_BF2, COL_B2 = 0, 8, 9, 10, 11
COL_WDW, COL_WF1, COL_WF2, COL_W2, COL_BF1 = 16, 32, 48, 64, 80

assert W & (W - 1) == 0, "reflect-pad column masks assume W is a power of two"
assert HW % 128 == 0, "keep the spatial plane lane-dense"
assert C_IN == C_OUT and CI_P == CO_P, "residual add requires inp == oup"
assert COL_BF1 + CE_P <= SLAB_C


# ---------------- fused Pallas kernel (whole batch, single invocation) ----------------

def fused_mb_kernel(x_ref, w_ref, o_ref):
    f32 = jnp.float32
    x = x_ref[...]                                        # (CI_P, HW) stacked batch (padded rows = 0)

    # --- static slices of the packed weight slab (brought in by a single DMA) ---
    w1 = w_ref[0:CE_P, COL_W1:COL_W1 + CI_P]              # (CE_P, CI_P) block-diag 1x1 expand
    b1 = w_ref[0:CE_P, COL_B1:COL_B1 + 1]                 # (CE_P, 1)
    bdw = w_ref[0:CE_P, COL_BDW:COL_BDW + 1]              # (CE_P, 1)
    bf2 = w_ref[0:CE_P, COL_BF2:COL_BF2 + 1]              # (CE_P, 1)
    b2 = w_ref[0:CO_P, COL_B2:COL_B2 + 1]                 # (CO_P, 1)
    wdw = w_ref[0:CE_P, COL_WDW:COL_WDW + K * K]          # (CE_P, 9) per-channel depthwise taps
    wf1 = w_ref[0:CE_P, COL_WF1:COL_WF1 + CE_P]           # (CE_P, CE_P) block-diag SE fc1 [in, out]
    wf2 = w_ref[0:CE_P, COL_WF2:COL_WF2 + CE_P]           # (CE_P, CE_P) block-diag SE fc2 [out, in]
    w2 = w_ref[0:CO_P, COL_W2:COL_W2 + CE_P]              # (CO_P, CE_P) block-diag 1x1 project
    bf1 = w_ref[0:1, COL_BF1:COL_BF1 + CE_P]              # (1, CE_P)

    def lrelu(v):
        return jnp.where(v > 0, v, NEG_SLOPE * v)

    # ---- 1x1 expand conv (MXU) + bias + LeakyReLU ----
    h1 = lrelu(jnp.dot(w1, x, preferred_element_type=f32) + b1)        # (CE_P, HW)

    # ---- 3x3 depthwise conv, stride 1, reflect padding, via lane rolls ----
    pos = lax.broadcasted_iota(jnp.int32, (1, HW), 1)     # narrow masks, broadcast inside where()
    colw = jnp.bitwise_and(pos, W - 1)                    # W is a power of two
    col_lo, col_hi = colw == 0, colw == W - 1
    row_lo, row_hi = pos < W, pos >= HW - W

    up_c = pltpu.roll(h1, W, axis=1)                      # circular value from row h-1 (hoisted)
    dn_c = pltpu.roll(h1, HW - W, axis=1)                 # circular value from row h+1 (hoisted)
    rows = (jnp.where(row_lo, dn_c, up_c),                # dy=0: row h-1, reflect -1 -> +1 at top
            h1,                                           # dy=1: same row
            jnp.where(row_hi, up_c, dn_c))                # dy=2: row h+1, reflect H -> H-2 at bottom

    parts = []
    for dy in range(K):                                   # 3 short, independent accumulation chains
        rv = rows[dy]
        pw = pltpu.roll(rv, 1, axis=1)                    # circular value at col w-1
        mw = pltpu.roll(rv, HW - 1, axis=1)               # circular value at col w+1
        left = jnp.where(col_lo, mw, pw)                  # reflect at w == 0
        right = jnp.where(col_hi, pw, mw)                 # reflect at w == W-1
        parts.append(left * wdw[:, K * dy + 0:K * dy + 1]
                     + rv * wdw[:, K * dy + 1:K * dy + 2]
                     + right * wdw[:, K * dy + 2:K * dy + 3])
    d = (parts[0] + parts[1]) + (parts[2] + bdw)          # (CE_P, HW)

    # ---- SEModule (reduction=1, no sigmoid -- exactly as in the spec) ----
    pooled = jnp.mean(d, axis=1, keepdims=True)                                   # (CE_P, 1)
    y1 = jnp.maximum(jnp.sum(wf1 * pooled, axis=0, keepdims=True) + bf1, 0.0)     # (1, CE_P)
    y = jnp.sum(wf2 * y1, axis=1, keepdims=True) + bf2                            # (CE_P, 1)

    # ---- SE scale, LeakyReLU, 1x1 project (MXU) + bias, residual add ----
    t = lrelu(d * y)
    o_ref[...] = jnp.dot(w2, t, preferred_element_type=f32) + b2 + x              # (CO_P, HW)


# ---------------- weight packing (one-time, model-load-style layout prep) ----------------

def pack_params(params):
    """Pack all 10 tiny weights/biases into ONE (SLAB_R, 128) f32 slab, in kernel-native,
    batch-block-diagonal layout. Single DMA at kernel start; static slices in-kernel."""
    w1, b1, wdw, bdw, wf1, bf1, wf2, bf2, w2, b2 = params

    def bdiag(m):                     # (a, b) -> (N*a, N*b) block-diagonal (per-image copies)
        a, b = m.shape
        out = jnp.zeros((N * a, N * b), jnp.float32)
        for n in range(N):
            out = out.at[n * a:(n + 1) * a, n * b:(n + 1) * b].set(m)
        return out

    slab = jnp.zeros((SLAB_R, SLAB_C), jnp.float32)
    slab = slab.at[0:CE, COL_W1:COL_W1 + CI].set(bdiag(w1))                       # 1x1 expand
    slab = slab.at[0:CE, COL_B1].set(jnp.tile(b1, N))
    slab = slab.at[0:CE, COL_BDW].set(jnp.tile(bdw, N))
    slab = slab.at[0:CE, COL_BF2].set(jnp.tile(bf2, N))
    slab = slab.at[0:CO, COL_B2].set(jnp.tile(b2, N))
    slab = slab.at[0:CE, COL_WDW:COL_WDW + K * K].set(
        jnp.tile(wdw.reshape(C_EXP, K * K), (N, 1)))                              # depthwise taps
    slab = slab.at[0:CE, COL_WF1:COL_WF1 + CE].set(bdiag(wf1.T))                  # SE fc1 [in, out]
    slab = slab.at[0:CE, COL_WF2:COL_WF2 + CE].set(bdiag(wf2))                    # SE fc2 [out, in]
    slab = slab.at[0:CO, COL_W2:COL_W2 + CE].set(bdiag(w2))                       # 1x1 project
    slab = slab.at[0, COL_BF1:COL_BF1 + CE].set(jnp.tile(bf1, N))
    return slab


# ---------------- wrapper ----------------

def mobile_bottleneck(x_nchw, slab):
    """Fused forward of UnetTMO.first_conv for the whole batch (one pallas_call, no grid)."""
    xs = x_nchw.reshape(CI, HW)                            # free reshape (N, C adjacent)
    xs = jnp.pad(xs, ((0, CI_P - CI), (0, 0)))             # pad sublanes to a multiple of 8
    out = pl.pallas_call(
        fused_mb_kernel,
        out_shape=jax.ShapeDtypeStruct((CO_P, HW), jnp.float32),
        in_specs=[pl.BlockSpec(memory_space=pltpu.MemorySpace.VMEM),    # x: one DMA
                  pl.BlockSpec(memory_space=pltpu.MemorySpace.VMEM)],   # packed weights: one DMA
        out_specs=pl.BlockSpec(memory_space=pltpu.MemorySpace.VMEM),
    )(xs, slab)
    return out[0:CO].reshape(N, C_OUT, H, W)               # drop pad rows, back to NCHW


# ---------------- pure-JAX reference (sanity check, matches the PyTorch module) ----------------

def ref_forward(x, params):
    w1, b1, wdw, bdw, wf1, bf1, wf2, bf2, w2, b2 = params
    hp = jax.lax.Precision.HIGHEST
    lrelu = lambda v: jnp.where(v > 0, v, NEG_SLOPE * v)
    h = jnp.einsum("nchw,ec->nehw", x, w1, precision=hp) + b1.reshape(1, C_EXP, 1, 1)
    h = lrelu(h)
    hpad = jnp.pad(h, ((0, 0), (0, 0), (1, 1), (1, 1)), mode="reflect")
    d = jnp.zeros_like(h)
    for dy in range(K):
        for dx in range(K):
            d = d + hpad[:, :, dy:dy + H, dx:dx + W] * wdw[:, dy, dx].reshape(1, C_EXP, 1, 1)
    d = d + bdw.reshape(1, C_EXP, 1, 1)
    p = jnp.mean(d, axis=(2, 3))                                                  # (N, C_EXP)
    y1 = jnp.maximum(jnp.einsum("nc,jc->nj", p, wf1, precision=hp) + bf1, 0.0)
    y = (jnp.einsum("nj,oj->no", y1, wf2, precision=hp) + bf2).reshape(N, C_EXP, 1, 1)
    t = lrelu(d * y)
    o = jnp.einsum("nehw,oe->nohw", t, w2, precision=hp) + b2.reshape(1, C_OUT, 1, 1)
    return x + o


# ---------------- main ----------------

if __name__ == "__main__":
    key = jax.random.PRNGKey(0)
    ks = jax.random.split(key, 11)

    x = jax.random.normal(ks[0], (N, C_IN, H, W), jnp.float32)

    s = 0.2   # deterministic synthetic parameters, PyTorch-native (out, in) layouts
    w1 = s * jax.random.normal(ks[1], (C_EXP, C_IN), jnp.float32)       # 1x1 expand
    b1 = s * jax.random.normal(ks[2], (C_EXP,), jnp.float32)
    wdw = s * jax.random.normal(ks[3], (C_EXP, K, K), jnp.float32)      # depthwise 3x3
    bdw = s * jax.random.normal(ks[4], (C_EXP,), jnp.float32)
    wf1 = s * jax.random.normal(ks[5], (C_EXP, C_EXP), jnp.float32)     # SE fc1
    bf1 = s * jax.random.normal(ks[6], (C_EXP,), jnp.float32)
    wf2 = s * jax.random.normal(ks[7], (C_EXP, C_EXP), jnp.float32)     # SE fc2
    bf2 = s * jax.random.normal(ks[8], (C_EXP,), jnp.float32)
    w2 = s * jax.random.normal(ks[9], (C_OUT, C_EXP), jnp.float32)      # 1x1 project
    b2 = s * jax.random.normal(ks[10], (C_OUT,), jnp.float32)

    params = (w1, b1, wdw, bdw, wf1, bf1, wf2, bf2, w2, b2)
    slab = jax.block_until_ready(pack_params(params))      # one-time weight layout prep

    out = jax.block_until_ready(jax.jit(mobile_bottleneck)(x, slab))
    ref = jax.block_until_ready(ref_forward(x, params))
    np.testing.assert_allclose(np.asarray(out), np.asarray(ref), rtol=1e-3, atol=1e-3)

    print("KERNEL_OK")
</pallas_src>

<mosaic_0001>
module attributes {stable_mosaic.version = 11 : i64} {
  func.func @fused_mb_kernel(%arg0: memref<8x256xf32, #tpu.memory_space<vmem>>, %arg1: memref<16x128xf32, #tpu.memory_space<vmem>>, %arg2: memref<8x256xf32, #tpu.memory_space<vmem>>) attributes {dimension_semantics = [], scalar_prefetch = 0 : i64, scratch_operands = 0 : i64, tpu.core_type = #tpu.core_type<tc>} {
    %c0 = arith.constant 0 : index
    %c0_0 = arith.constant 0 : index
    %0 = vector.load %arg0[%c0, %c0_0] : memref<8x256xf32, #tpu.memory_space<vmem>>, vector<8x256xf32>
    %c0_1 = arith.constant 0 : index
    %c0_2 = arith.constant 0 : index
    %1 = vector.load %arg1[%c0_1, %c0_2] : memref<16x128xf32, #tpu.memory_space<vmem>>, vector<16x8xf32>
    %c0_3 = arith.constant 0 : index
    %c8 = arith.constant 8 : index
    %2 = vector.load %arg1[%c0_3, %c8] : memref<16x128xf32, #tpu.memory_space<vmem>>, vector<16x1xf32>
    %c0_4 = arith.constant 0 : index
    %c9 = arith.constant 9 : index
    %3 = vector.load %arg1[%c0_4, %c9] : memref<16x128xf32, #tpu.memory_space<vmem>>, vector<16x1xf32>
    %c0_5 = arith.constant 0 : index
    %c10 = arith.constant 10 : index
    %4 = vector.load %arg1[%c0_5, %c10] : memref<16x128xf32, #tpu.memory_space<vmem>>, vector<16x1xf32>
    %c0_6 = arith.constant 0 : index
    %c11 = arith.constant 11 : index
    %5 = vector.load %arg1[%c0_6, %c11] : memref<16x128xf32, #tpu.memory_space<vmem>>, vector<8x1xf32>
    %c0_7 = arith.constant 0 : index
    %c16 = arith.constant 16 : index
    %6 = vector.load %arg1[%c0_7, %c16] : memref<16x128xf32, #tpu.memory_space<vmem>>, vector<16x9xf32>
    %c0_8 = arith.constant 0 : index
    %c32 = arith.constant 32 : index
    %7 = vector.load %arg1[%c0_8, %c32] : memref<16x128xf32, #tpu.memory_space<vmem>>, vector<16x16xf32>
    %c0_9 = arith.constant 0 : index
    %c48 = arith.constant 48 : index
    %8 = vector.load %arg1[%c0_9, %c48] : memref<16x128xf32, #tpu.memory_space<vmem>>, vector<16x16xf32>
    %c0_10 = arith.constant 0 : index
    %c64 = arith.constant 64 : index
    %9 = vector.load %arg1[%c0_10, %c64] : memref<16x128xf32, #tpu.memory_space<vmem>>, vector<8x16xf32>
    %c0_11 = arith.constant 0 : index
    %c80 = arith.constant 80 : index
    %10 = vector.load %arg1[%c0_11, %c80] : memref<16x128xf32, #tpu.memory_space<vmem>>, vector<1x16xf32>
    %cst = arith.constant dense<0.000000e+00> : vector<16x256xf32>
    %11 = tpu.matmul %1, %0, %cst {dimension_numbers = #tpu.dot_dimension_numbers<[1], [0], [0], [1], [0, 0, 1, 1], [], []>} : vector<16x8xf32>, vector<8x256xf32>, vector<16x256xf32> -> vector<16x256xf32>
    %12 = vector.broadcast %2 : vector<16x1xf32> to vector<16x256xf32>
    %13 = arith.addf %11, %12 : vector<16x256xf32>
    %cst_12 = arith.constant 0.000000e+00 : f32
    %14 = vector.broadcast %cst_12 : f32 to vector<16x256xf32>
    %15 = arith.cmpf ogt, %13, %14 : vector<16x256xf32>
    %cst_13 = arith.constant 0.00999999977 : f32
    %16 = vector.broadcast %cst_13 : f32 to vector<16x256xf32>
    %17 = arith.mulf %16, %13 : vector<16x256xf32>
    %18 = arith.select %15, %13, %17 : vector<16x256xi1>, vector<16x256xf32>
    %19 = tpu.iota {dimensions = array<i32: 1>} : vector<1x256xi32>
    %c15_i32 = arith.constant 15 : i32
    %20 = vector.broadcast %c15_i32 : i32 to vector<1x256xi32>
    %21 = arith.andi %19, %20 : vector<1x256xi32>
    %c0_i32 = arith.constant 0 : i32
    %22 = vector.broadcast %c0_i32 : i32 to vector<1x256xi32>
    %23 = arith.cmpi eq, %21, %22 : vector<1x256xi32>
    %c15_i32_14 = arith.constant 15 : i32
    %24 = vector.broadcast %c15_i32_14 : i32 to vector<1x256xi32>
    %25 = arith.cmpi eq, %21, %24 : vector<1x256xi32>
    %c16_i32 = arith.constant 16 : i32
    %26 = vector.broadcast %c16_i32 : i32 to vector<1x256xi32>
    %27 = arith.cmpi slt, %19, %26 : vector<1x256xi32>
    %c240_i32 = arith.constant 240 : i32
    %28 = vector.broadcast %c240_i32 : i32 to vector<1x256xi32>
    %29 = arith.cmpi sge, %19, %28 : vector<1x256xi32>
    %c16_i32_15 = arith.constant 16 : i32
    %30 = tpu.dynamic_rotate %18 by %c16_i32_15 dim 1 : vector<16x256xf32>, i32 -> vector<16x256xf32>
    %c240_i32_16 = arith.constant 240 : i32
    %31 = tpu.dynamic_rotate %18 by %c240_i32_16 dim 1 : vector<16x256xf32>, i32 -> vector<16x256xf32>
    %32 = vector.shape_cast %27 : vector<1x256xi1> to vector<1x256xi1>
    %33 = vector.broadcast %32 : vector<1x256xi1> to vector<16x256xi1>
    %34 = arith.select %33, %31, %30 : vector<16x256xi1>, vector<16x256xf32>
    %35 = vector.shape_cast %29 : vector<1x256xi1> to vector<1x256xi1>
    %36 = vector.broadcast %35 : vector<1x256xi1> to vector<16x256xi1>
    %37 = arith.select %36, %30, %31 : vector<16x256xi1>, vector<16x256xf32>
    %c1_i32 = arith.constant 1 : i32
    %38 = tpu.dynamic_rotate %34 by %c1_i32 dim 1 : vector<16x256xf32>, i32 -> vector<16x256xf32>
    %c255_i32 = arith.constant 255 : i32
    %39 = tpu.dynamic_rotate %34 by %c255_i32 dim 1 : vector<16x256xf32>, i32 -> vector<16x256xf32>
    %40 = vector.shape_cast %23 : vector<1x256xi1> to vector<1x256xi1>
    %41 = vector.broadcast %40 : vector<1x256xi1> to vector<16x256xi1>
    %42 = arith.select %41, %39, %38 : vector<16x256xi1>, vector<16x256xf32>
    %43 = vector.shape_cast %25 : vector<1x256xi1> to vector<1x256xi1>
    %44 = vector.broadcast %43 : vector<1x256xi1> to vector<16x256xi1>
    %45 = arith.select %44, %38, %39 : vector<16x256xi1>, vector<16x256xf32>
    %46 = vector.extract_strided_slice %6 {offsets = [0, 0], sizes = [16, 1], strides = [1, 1]} : vector<16x9xf32> to vector<16x1xf32>
    %47 = vector.broadcast %46 : vector<16x1xf32> to vector<16x256xf32>
    %48 = arith.mulf %42, %47 : vector<16x256xf32>
    %49 = vector.extract_strided_slice %6 {offsets = [0, 1], sizes = [16, 1], strides = [1, 1]} : vector<16x9xf32> to vector<16x1xf32>
    %50 = vector.broadcast %49 : vector<16x1xf32> to vector<16x256xf32>
    %51 = arith.mulf %34, %50 : vector<16x256xf32>
    %52 = arith.addf %48, %51 : vector<16x256xf32>
    %53 = vector.extract_strided_slice %6 {offsets = [0, 2], sizes = [16, 1], strides = [1, 1]} : vector<16x9xf32> to vector<16x1xf32>
    %54 = vector.broadcast %53 : vector<16x1xf32> to vector<16x256xf32>
    %55 = arith.mulf %45, %54 : vector<16x256xf32>
    %56 = arith.addf %52, %55 : vector<16x256xf32>
    %c1_i32_17 = arith.constant 1 : i32
    %57 = tpu.dynamic_rotate %18 by %c1_i32_17 dim 1 : vector<16x256xf32>, i32 -> vector<16x256xf32>
    %c255_i32_18 = arith.constant 255 : i32
    %58 = tpu.dynamic_rotate %18 by %c255_i32_18 dim 1 : vector<16x256xf32>, i32 -> vector<16x256xf32>
    %59 = vector.shape_cast %23 : vector<1x256xi1> to vector<1x256xi1>
    %60 = vector.broadcast %59 : vector<1x256xi1> to vector<16x256xi1>
    %61 = arith.select %60, %58, %57 : vector<16x256xi1>, vector<16x256xf32>
    %62 = vector.shape_cast %25 : vector<1x256xi1> to vector<1x256xi1>
    %63 = vector.broadcast %62 : vector<1x256xi1> to vector<16x256xi1>
    %64 = arith.select %63, %57, %58 : vector<16x256xi1>, vector<16x256xf32>
    %65 = vector.extract_strided_slice %6 {offsets = [0, 3], sizes = [16, 1], strides = [1, 1]} : vector<16x9xf32> to vector<16x1xf32>
    %66 = vector.broadcast %65 : vector<16x1xf32> to vector<16x256xf32>
    %67 = arith.mulf %61, %66 : vector<16x256xf32>
    %68 = vector.extract_strided_slice %6 {offsets = [0, 4], sizes = [16, 1], strides = [1, 1]} : vector<16x9xf32> to vector<16x1xf32>
    %69 = vector.broadcast %68 : vector<16x1xf32> to vector<16x256xf32>
    %70 = arith.mulf %18, %69 : vector<16x256xf32>
    %71 = arith.addf %67, %70 : vector<16x256xf32>
    %72 = vector.extract_strided_slice %6 {offsets = [0, 5], sizes = [16, 1], strides = [1, 1]} : vector<16x9xf32> to vector<16x1xf32>
    %73 = vector.broadcast %72 : vector<16x1xf32> to vector<16x256xf32>
    %74 = arith.mulf %64, %73 : vector<16x256xf32>
    %75 = arith.addf %71, %74 : vector<16x256xf32>
    %c1_i32_19 = arith.constant 1 : i32
    %76 = tpu.dynamic_rotate %37 by %c1_i32_19 dim 1 : vector<16x256xf32>, i32 -> vector<16x256xf32>
    %c255_i32_20 = arith.constant 255 : i32
    %77 = tpu.dynamic_rotate %37 by %c255_i32_20 dim 1 : vector<16x256xf32>, i32 -> vector<16x256xf32>
    %78 = vector.shape_cast %23 : vector<1x256xi1> to vector<1x256xi1>
    %79 = vector.broadcast %78 : vector<1x256xi1> to vector<16x256xi1>
    %80 = arith.select %79, %77, %76 : vector<16x256xi1>, vector<16x256xf32>
    %81 = vector.shape_cast %25 : vector<1x256xi1> to vector<1x256xi1>
    %82 = vector.broadcast %81 : vector<1x256xi1> to vector<16x256xi1>
    %83 = arith.select %82, %76, %77 : vector<16x256xi1>, vector<16x256xf32>
    %84 = vector.extract_strided_slice %6 {offsets = [0, 6], sizes = [16, 1], strides = [1, 1]} : vector<16x9xf32> to vector<16x1xf32>
    %85 = vector.broadcast %84 : vector<16x1xf32> to vector<16x256xf32>
    %86 = arith.mulf %80, %85 : vector<16x256xf32>
    %87 = vector.extract_strided_slice %6 {offsets = [0, 7], sizes = [16, 1], strides = [1, 1]} : vector<16x9xf32> to vector<16x1xf32>
    %88 = vector.broadcast %87 : vector<16x1xf32> to vector<16x256xf32>
    %89 = arith.mulf %37, %88 : vector<16x256xf32>
    %90 = arith.addf %86, %89 : vector<16x256xf32>
    %91 = vector.extract_strided_slice %6 {offsets = [0, 8], sizes = [16, 1], strides = [1, 1]} : vector<16x9xf32> to vector<16x1xf32>
    %92 = vector.broadcast %91 : vector<16x1xf32> to vector<16x256xf32>
    %93 = arith.mulf %83, %92 : vector<16x256xf32>
    %94 = arith.addf %90, %93 : vector<16x256xf32>
    %95 = arith.addf %56, %75 : vector<16x256xf32>
    %96 = vector.broadcast %3 : vector<16x1xf32> to vector<16x256xf32>
    %97 = arith.addf %94, %96 : vector<16x256xf32>
    %98 = arith.addf %95, %97 : vector<16x256xf32>
    %cst_21 = arith.constant dense<0.000000e+00> : vector<16xf32>
    %99 = vector.multi_reduction <add>, %98, %cst_21 [1] : vector<16x256xf32> to vector<16xf32>
    %100 = vector.shape_cast %99 : vector<16xf32> to vector<16x1xf32>
    %cst_22 = arith.constant 2.560000e+02 : f32
    %101 = vector.broadcast %cst_22 : f32 to vector<16x1xf32>
    %102 = arith.divf %100, %101 : vector<16x1xf32>
    %103 = vector.broadcast %102 : vector<16x1xf32> to vector<16x16xf32>
    %104 = arith.mulf %7, %103 : vector<16x16xf32>
    %cst_23 = arith.constant dense<0.000000e+00> : vector<16xf32>
    %105 = vector.multi_reduction <add>, %104, %cst_23 [0] : vector<16x16xf32> to vector<16xf32>
    %106 = vector.shape_cast %105 : vector<16xf32> to vector<1x16xf32>
    %107 = arith.addf %106, %10 : vector<1x16xf32>
    %cst_24 = arith.constant 0.000000e+00 : f32
    %108 = vector.broadcast %cst_24 : f32 to vector<1x16xf32>
    %109 = arith.maximumf %107, %108 : vector<1x16xf32>
    %110 = vector.broadcast %109 : vector<1x16xf32> to vector<16x16xf32>
    %111 = arith.mulf %8, %110 : vector<16x16xf32>
    %cst_25 = arith.constant dense<0.000000e+00> : vector<16xf32>
    %112 = vector.multi_reduction <add>, %111, %cst_25 [1] : vector<16x16xf32> to vector<16xf32>
    %113 = vector.shape_cast %112 : vector<16xf32> to vector<16x1xf32>
    %114 = arith.addf %113, %4 : vector<16x1xf32>
    %115 = vector.broadcast %114 : vector<16x1xf32> to vector<16x256xf32>
    %116 = arith.mulf %98, %115 : vector<16x256xf32>
    %cst_26 = arith.constant 0.000000e+00 : f32
    %117 = vector.broadcast %cst_26 : f32 to vector<16x256xf32>
    %118 = arith.cmpf ogt, %116, %117 : vector<16x256xf32>
    %cst_27 = arith.constant 0.00999999977 : f32
    %119 = vector.broadcast %cst_27 : f32 to vector<16x256xf32>
    %120 = arith.mulf %119, %116 : vector<16x256xf32>
    %121 = arith.select %118, %116, %120 : vector<16x256xi1>, vector<16x256xf32>
    %cst_28 = arith.constant dense<0.000000e+00> : vector<8x256xf32>
    %122 = tpu.matmul %9, %121, %cst_28 {dimension_numbers = #tpu.dot_dimension_numbers<[1], [0], [0], [1], [0, 0, 1, 1], [], []>} : vector<8x16xf32>, vector<16x256xf32>, vector<8x256xf32> -> vector<8x256xf32>
    %123 = vector.broadcast %5 : vector<8x1xf32> to vector<8x256xf32>
    %124 = arith.addf %122, %123 : vector<8x256xf32>
    %125 = arith.addf %124, %0 : vector<8x256xf32>
    %c0_29 = arith.constant 0 : index
    %c0_30 = arith.constant 0 : index
    %126 = vector.load %arg2[%c0_29, %c0_30] : memref<8x256xf32, #tpu.memory_space<vmem>>, vector<8x256xf32>
    tpu.vector_store %arg2[%c0_29, %c0_30], %125 {strides = array<i32>} : memref<8x256xf32, #tpu.memory_space<vmem>>, vector<8x256xf32>,
    return
  }
}

</mosaic_0001>

<bundles_post_ra>
// kernel: mobile_bottleneck.1
= control target key start
LH: loop header
LB: loop body
LE: loop exit
PB: predicated region body
PF: predicated region fallthrough
CT: control target
= control target key end

     0   :  { %v650_v2 = vmov 0.0   ;;  %vm27_vm0 = vcmask 64512   ;;  %v651_v4 = vmov 8   ;;  %v652_v6 = vmov 16   ;;  %s660_s17 = smov 16   ;;  %s662_s18 = smov 1   ;;  %s1069_s0 = inlined_call_operand.vmem [shape: f32[8,256], index: 0, kind: input, shape index: {}]   ;;  %s1070_s1 = inlined_call_operand.vmem [shape: f32[16,128], index: 1, kind: input, shape index: {}]   ;;  %s1071_s2 = inlined_call_operand.vmem [shape: f32[8,256], index: 2, kind: output, shape index: {}]  }
   0x1   :  { %v688_v0 = vld [vmem:[%s1069_s0 + $0x8] sm:$0xff]  ;;  %v693_v1 = vld [vmem:[%s1069_s0] sm:$0xff]  ;;  %96 = vmatprep.mubr.f32.mxu0 %v650_v2  ;;  %628 = vset.pattern.permute.xlu0 %v651_v4  ;;  %v653_v7 = vmov 17   ;;  %v654_v8 = vmov 19   ;;  %v655_v9 = vmov 20   ;;  %v656_v10 = vmov 22  }
   0x2   :  { %v698_v3 = vld [vmem:[%s1070_s1] sm:$0xff]  ;;  %32 = vmatprep.subr.mxu0 %v688_v0  ;;  %v706_v5 = vld [vmem:[%s1070_s1 + $0x8] sm:$0xff]  ;;  %630 = vset.pattern.permute.xlu1 %v652_v6  ;;  %v657_v11 = vmov 23   ;;  %v658_v12 = vmov 18   ;;  %s659_s0 = smov 112   ;;  %v661_v29 = vmov 21   ;;  %v121_v45 = vlaneseq }
   0x3   :  { %19 = vperm.xlu0 %628, %v698_v3   ;;  %33 = vmatpush1.msra.mxu0 %v693_v1  ;;  %v663_v32 = vmov 9   ;;  %v664_v33 = vmov 24   ;;  %s665_s19 = smov 127   ;;  %s666_s22 = smov 80   ;;  %vm444_vm14 = vcmask 392448   ;;  %vm478_vm15 = vcmask 130048  }
   0x4   :  { %601 = vmatmul.mubr.msk.f32.vlgmr.msra.gmra.mrb[0].mxu0 %vm27_vm0, %v698_v3  ;;  %222 = vperm.xlu1 %630, %v706_v5   ;;  %v788_v47 = vand.u32 127, %v121_v45 }
   0x5   :  { %102 = vmatprep.mubr.f32.mxu0 %v650_v2  ;;  %586 = vmatprep.mubr.f32.mxu1 %v650_v2 }
   0x6   :  { %vm130_vm5 = vcmp.lt.s32.totalorder %v788_v47, 16  ;;  %vm154_vm6 = vcmp.lt.s32.totalorder %v788_v47, 112  ;;  %v123_v58 = vadd.s32 128, %v788_v47  ;;  %vm183_vm9 = vcmp.lt.s32.totalorder %v788_v47, 1 }
   0x7   :  { %24 = vperm.xlu0 %628, %v706_v5   ;;  %vm196_vm10 = vcmp.lt.s32.totalorder %v788_v47, 127 }
   0x8   :  { %602 = vmatmul.mubr.msk.f32.gmra.mrb[2].mxu0 %vm27_vm0, %v706_v5  ;;  %631 = vset.pattern.permute.xlu1 %v653_v7  ;;  %vm133_vm7 = vcmp.ge.s32.totalorder %v123_v58, 240 }
   0x9   :  { %230 = vperm.xlu1 %631, %v698_v3  }
   0xb   :  { %629 = vset.pattern.permute.xlu0 %v652_v6 }
   0xc   :  { %218 = vperm.xlu0 %629, %v698_v3  }
   0xd   :  { %633 = vset.pattern.permute.xlu1 %v654_v8 }
   0xe   :  { %294 = vperm.xlu1 %633, %v698_v3  }
  0x10   :  { %632 = vset.pattern.permute.xlu0 %v653_v7 }
  0x11   :  { %234 = vperm.xlu0 %632, %v706_v5  }
  0x12   :  { %298 = vperm.xlu1 %633, %v706_v5  }
  0x15   :  { %634 = vset.pattern.permute.xlu0 %v655_v9 }
  0x16   :  { %306 = vperm.xlu0 %634, %v698_v3   ;;  %635 = vset.pattern.permute.xlu1 %v655_v9 }
  0x17   :  { %310 = vperm.xlu1 %635, %v706_v5  }
  0x1a   :  { %637 = vset.pattern.permute.xlu0 %v656_v10 }
  0x1b   :  { %374 = vperm.xlu0 %637, %v706_v5   ;;  %636 = vset.pattern.permute.xlu1 %v656_v10 }
  0x1c   :  { %370 = vperm.xlu1 %636, %v698_v3  }
  0x1f   :  { %639 = vset.pattern.permute.xlu0 %v658_v12 }
  0x20   :  { %638 = vset.pattern.permute.xlu1 %v657_v11 }
  0x21   :  { %382 = vperm.xlu1 %638, %v698_v3  }
  0x25   :  { %386 = vperm.xlu1 %638, %v706_v5  }
  0x29   :  { %640 = vset.pattern.permute.xlu1 %v658_v12 }
  0x82   :  { %v20_v13 = vpop.permute.xlu0 %19 }
  0x83   :  { %v765_v34 = vpop.permute.xlu1 %222 }
  0x86   :  { %v25_v19 = vpop.permute.xlu0 %24 }
  0x88   :  { %v767_v35 = vpop.permute.xlu1 %230 }
  0x8b   :  { %v773_v38 = vpop.permute.xlu0 %218 }
  0x8d   :  { %v769_v36 = vpop.permute.xlu1 %294 }
  0x90   :  { %v777_v40 = vpop.permute.xlu0 %234 }
  0x91   :  { %v771_v37 = vpop.permute.xlu1 %298 }
  0x95   :  { %v781_v42 = vpop.permute.xlu0 %306 }
  0x96   :  { %v775_v39 = vpop.permute.xlu1 %310 }
  0x9a   :  { %v785_v44 = vpop.permute.xlu0 %374 }
  0x9b   :  { %v779_v41 = vpop.permute.xlu1 %370 }
  0xa0   :  { %v783_v43 = vpop.permute.xlu1 %382 }
  0xa4   :  { %v387_v46 = vpop.permute.xlu1 %386 }
  0xd7   :  { %v98_v14 = vpop.f32.mrb[0].mxu0 }
  0xd8   :  { %v99_v15 = vadd.f32 %v98_v14, %v20_v13  ;;  %v100_v16 = vpop.f32.mrb[1].mxu0 }
  0xd9   :  { %v101_v17 = vadd.f32 %v100_v16, %v20_v13  ;;  %v124_v16 = vand.u32 15, %v788_v47 }
  0xda   :  { %vm109_vm1 = vcmp.gt.f32.partialorder %v99_v15, 0.0  ;;  %v113_v18 = vmul.f32 0.01, %v99_v15 }
  0xdb   :  { %v104_v20 = vpop.f32.mrb[2].mxu0  ;;  %v114_v22 = vmul.f32 0.01, %v101_v17  ;;  %vm110_vm2 = vcmp.gt.f32.partialorder %v101_v17, 0.0  ;;  %vm870_vm12 = vcmp.eq.s32.totalorder %v124_v16, 0  ;;  %vm874_vm13 = vcmp.eq.s32.totalorder %v124_v16, 15 }
  0xdc   :  { %v723_v21 = vsel %vm109_vm1, %v99_v15, %v113_v18  ;;  %v105_v23 = vadd.f32 %v104_v20, %v25_v19  ;;  %v106_v24 = vpop.f32.mrb[3].mxu0  ;;  %v125_v15 = vand.u32 15, %v123_v58 }
  0xdd   :  { %146 = vrot.lane.b32.xlu0 %v723_v21, %s659_s0  ;;  %134 = vrot.lane.b32.xlu1 %v723_v21, %s660_s17  ;;  %v728_v25 = vsel %vm110_vm2, %v101_v17, %v114_v22  ;;  %v107_v28 = vadd.f32 %v106_v24, %v25_v19 }
  0xde   :  { %v115_v26 = vmul.f32 0.01, %v105_v23  ;;  %vm111_vm3 = vcmp.gt.f32.partialorder %v105_v23, 0.0  ;;  %vm858_vm8 = vcmp.eq.s32.totalorder %v125_v15, 0  ;;  %vm866_vm11 = vcmp.eq.s32.totalorder %v125_v15, 15 }
  0xdf   :  { %v116_v30 = vmul.f32 0.01, %v107_v28  ;;  %vm112_vm4 = vcmp.gt.f32.partialorder %v107_v28, 0.0 }
  0xe0   :  { %v733_v27 = vsel %vm111_vm3, %v105_v23, %v115_v26 }
  0xe1   :  { %138 = vrot.lane.b32.xlu0 %v728_v25, %s660_s17  ;;  %250 = vperm.xlu1 %640, %v706_v5   ;;  %v740_v31 = vsel %vm112_vm4, %v107_v28, %v116_v30 }
  0xe5   :  { %150 = vrot.lane.b32.xlu0 %v728_v25, %s659_s0  ;;  %136 = vrot.lane.b32.xlu1 %v733_v27, %s660_s17 }
  0xe6   :  { %641 = vset.pattern.permute.xlu1 %v661_v29 }
  0xe9   :  { %246 = vperm.xlu0 %639, %v698_v3   ;;  %148 = vrot.lane.b32.xlu1 %v733_v27, %s659_s0 }
  0xed   :  { %642 = vset.pattern.permute.xlu0 %v661_v29  ;;  %140 = vrot.lane.b32.xlu1 %v740_v31, %s660_s17 }
  0xee   :  { %326 = vperm.xlu0 %642, %v706_v5  }
  0xf1   :  { %152 = vrot.lane.b32.xlu1 %v740_v31, %s659_s0 }
  0xf2   :  { %261 = vrot.lane.b32.xlu0 %v723_v21, %s662_s18 }
  0xf3   :  { %644 = vset.pattern.permute.xlu0 %v663_v32 }
  0xf5   :  { %322 = vperm.xlu1 %641, %v698_v3  }
  0xf6   :  { %265 = vrot.lane.b32.xlu0 %v728_v25, %s662_s18 }
  0xf9   :  { %643 = vset.pattern.permute.xlu1 %v664_v33 }
  0xfa   :  { %273 = vrot.lane.b32.xlu0 %v723_v21, %s665_s19  ;;  %398 = vperm.xlu1 %643, %v698_v3  }
  0xfe   :  { %277 = vrot.lane.b32.xlu0 %v728_v25, %s665_s19  ;;  %402 = vperm.xlu1 %643, %v706_v5  }
 0x102   :  { %263 = vrot.lane.b32.xlu1 %v733_v27, %s662_s18 }
 0x103   :  { %645 = vset.pattern.permute.xlu1 %v663_v32 }
 0x106   :  { %275 = vrot.lane.b32.xlu1 %v733_v27, %s665_s19 }
 0x10a   :  { %267 = vrot.lane.b32.xlu1 %v740_v31, %s662_s18 }
 0x10e   :  { %279 = vrot.lane.b32.xlu1 %v740_v31, %s665_s19 }
 0x14f   :  { %v147_v48 = vpop.permute.xlu0 %146  ;;  %v135_v49 = vpop.permute.xlu1 %134 }
 0x153   :  { %v139_v50 = vpop.permute.xlu0 %138 }
 0x154   :  { %v793_v51 = vsel %vm130_vm5, %v135_v49, %v139_v50  ;;  %v144_v55 = vsel %vm130_vm5, %v139_v50, %v135_v49 }
 0x155   :  { %179 = vrot.lane.b32.xlu0 %v793_v51, %s662_s18 }
 0x157   :  { %v151_v52 = vpop.permute.xlu0 %150 }
 0x158   :  { %v802_v53 = vsel %vm154_vm6, %v147_v48, %v151_v52  ;;  %v157_v61 = vsel %vm154_vm6, %v151_v52, %v147_v48 }
 0x159   :  { %192 = vrot.lane.b32.xlu0 %v793_v51, %s665_s19  ;;  %v815_v57 = vsel %vm130_vm5, %v802_v53, %v144_v55  ;;  %v827_v63 = vsel %vm133_vm7, %v793_v51, %v157_v61  ;;  %v313_v55 = vmul.f32 %v781_v42, %v723_v21 }
 0x15d   :  { %337 = vrot.lane.b32.xlu0 %v802_v53, %s662_s18 }
 0x160   :  { %v806_v54 = vpop.permute.xlu1 %250 }
 0x161   :  { %349 = vrot.lane.b32.xlu0 %v802_v53, %s665_s19 }
 0x164   :  { %v137_v56 = vpop.permute.xlu1 %136 }
 0x165   :  { %175 = vrot.lane.b32.xlu0 %v815_v57, %s662_s18 }
 0x168   :  { %v149_v59 = vpop.permute.xlu1 %148  ;;  %v820_v60 = vpop.permute.xlu0 %246 }
 0x169   :  { %188 = vrot.lane.b32.xlu0 %v815_v57, %s665_s19 }
 0x16c   :  { %v141_v62 = vpop.permute.xlu1 %140 }
 0x16d   :  { %v831_v2 = vsel %vm130_vm5, %v137_v56, %v141_v62  ;;  %v833_v4 = vpop.permute.xlu0 %326  ;;  %341 = vrot.lane.b32.xlu0 %v827_v63, %s662_s18  ;;  %v145_v20 = vsel %vm130_vm5, %v141_v62, %v137_v56  ;;  %v314_v56 = vmul.f32 %v781_v42, %v728_v25  ;;  %v315_v25 = vmul.f32 %v775_v39, %v733_v27 }
 0x16e   :  { %181 = vrot.lane.b32.xlu1 %v831_v2, %s662_s18 }
 0x170   :  { %v153_v6 = vpop.permute.xlu1 %152 }
 0x171   :  { %v156_v7 = vsel %vm154_vm6, %v149_v59, %v153_v6  ;;  %v158_v8 = vsel %vm154_vm6, %v153_v6, %v149_v59  ;;  %v262_v9 = vpop.permute.xlu0 %261  ;;  %353 = vrot.lane.b32.xlu0 %v827_v63, %s665_s19 }
 0x172   :  { %v845_v10 = vmul.f32 %v387_v46, %v156_v7  ;;  %194 = vrot.lane.b32.xlu1 %v831_v2, %s665_s19  ;;  %v174_v11 = vsel %vm133_vm7, %v831_v2, %v158_v8  ;;  %v882_v29 = vsel %vm130_vm5, %v156_v7, %v145_v20 }
 0x173   :  { %v850_v12 = vmul.f32 %v387_v46, %v174_v11 }
 0x174   :  { %v323_v13 = vpop.permute.xlu1 %322 }
 0x175   :  { %v266_v14 = vpop.permute.xlu0 %265  ;;  %418 = vperm.xlu0 %644, %v698_v3  }
 0x176   :  { %339 = vrot.lane.b32.xlu1 %v156_v7, %s662_s18  ;;  %v269_v30 = vsel %vm183_vm9, %v262_v9, %v266_v14  ;;  %v271_v32 = vsel %vm183_vm9, %v266_v14, %v262_v9 }
 0x179   :  { %v274_v17 = vpop.permute.xlu0 %273  ;;  %v855_v18 = vpop.permute.xlu1 %398 }
 0x17a   :  { %351 = vrot.lane.b32.xlu1 %v156_v7, %s665_s19 }
 0x17d   :  { %v278_v26 = vpop.permute.xlu0 %277  ;;  %v878_v28 = vpop.permute.xlu1 %402 }
 0x17e   :  { %v281_v33 = vsel %vm196_vm10, %v274_v17, %v278_v26  ;;  %v283_v46 = vsel %vm196_vm10, %v278_v26, %v274_v17  ;;  %177 = vrot.lane.b32.xlu1 %v882_v29, %s662_s18 }
 0x17f   :  { %v285_v48 = vsel %vm870_vm12, %v281_v33, %v271_v32  ;;  %v286_v49 = vsel %vm858_vm8, %v283_v46, %v269_v30  ;;  %v289_v50 = vsel %vm874_vm13, %v271_v32, %v281_v33  ;;  %v290_v52 = vsel %vm866_vm11, %v269_v30, %v283_v46 }
 0x180   :  { %v301_v58 = vmul.f32 %v769_v36, %v285_v48  ;;  %v302_v59 = vmul.f32 %v769_v36, %v286_v49  ;;  %v329_v7 = vmul.f32 %v323_v13, %v289_v50  ;;  %v330_v8 = vmul.f32 %v323_v13, %v290_v52 }
 0x181   :  { %v264_v61 = vpop.permute.xlu1 %263  ;;  %v316_v36 = vmul.f32 %v775_v39, %v740_v31 }
 0x182   :  { %v317_v62 = vadd.f32 %v313_v55, %v301_v58  ;;  %v318_v6 = vadd.f32 %v314_v56, %v302_v59  ;;  %190 = vrot.lane.b32.xlu1 %v882_v29, %s665_s19 }
 0x184   :  { %v333_v9 = vadd.f32 %v329_v7, %v317_v62  ;;  %v334_v14 = vadd.f32 %v330_v8, %v318_v6 }
 0x185   :  { %v276_v15 = vpop.permute.xlu1 %275 }
 0x186   :  { %343 = vrot.lane.b32.xlu1 %v174_v11, %s662_s18 }
 0x189   :  { %v268_v21 = vpop.permute.xlu1 %267 }
 0x18a   :  { %355 = vrot.lane.b32.xlu1 %v174_v11, %s665_s19  ;;  %v270_v13 = vsel %vm183_vm9, %v264_v61, %v268_v21  ;;  %v272_v16 = vsel %vm183_vm9, %v268_v21, %v264_v61 }
 0x18d   :  { %v280_v42 = vpop.permute.xlu1 %279 }
 0x18e   :  { %v282_v17 = vsel %vm196_vm10, %v276_v15, %v280_v42  ;;  %v284_v20 = vsel %vm196_vm10, %v280_v42, %v276_v15  ;;  %422 = vperm.xlu1 %645, %v706_v5  }
 0x18f   :  { %v287_v27 = vsel %vm870_vm12, %v282_v17, %v272_v16  ;;  %v288_v31 = vsel %vm858_vm8, %v284_v20, %v270_v13  ;;  %v291_v39 = vsel %vm874_vm13, %v272_v16, %v282_v17  ;;  %v292_v11 = vsel %vm866_vm11, %v270_v13, %v284_v20 }
 0x190   :  { %v303_v26 = vmul.f32 %v771_v37, %v287_v27  ;;  %v304_v30 = vmul.f32 %v771_v37, %v288_v31  ;;  %v331_v32 = vmul.f32 %v833_v4, %v291_v39  ;;  %v332_v33 = vmul.f32 %v833_v4, %v292_v11 }
 0x192   :  { %v319_v46 = vadd.f32 %v315_v25, %v303_v26  ;;  %v320_v48 = vadd.f32 %v316_v36, %v304_v30  ;;  %v238_v25 = vmul.f32 %v767_v35, %v793_v51  ;;  %v237_v36 = vmul.f32 %v767_v35, %v815_v57 }
 0x194   :  { %v937_v49 = vadd.f32 %v331_v32, %v319_v46  ;;  %v939_v50 = vadd.f32 %v332_v33, %v320_v48 }
 0x1c7   :  { %v180_v52 = vpop.permute.xlu0 %179 }
 0x1cb   :  { %v193_v55 = vpop.permute.xlu0 %192 }
 0x1cf   :  { %v338_v56 = vpop.permute.xlu0 %337 }
 0x1d3   :  { %v350_v58 = vpop.permute.xlu0 %349 }
 0x1d7   :  { %v176_v59 = vpop.permute.xlu0 %175 }
 0x1d8   :  { %v184_v62 = vsel %vm183_vm9, %v176_v59, %v180_v52  ;;  %v186_v37 = vsel %vm183_vm9, %v180_v52, %v176_v59 }
 0x1db   :  { %v189_v61 = vpop.permute.xlu0 %188 }
 0x1dc   :  { %v197_v4 = vsel %vm196_vm10, %v189_v61, %v193_v55  ;;  %v199_v6 = vsel %vm196_vm10, %v193_v55, %v189_v61 }
 0x1dd   :  { %v205_v7 = vsel %vm870_vm12, %v197_v4, %v186_v37  ;;  %v206_v8 = vsel %vm858_vm8, %v199_v6, %v184_v62  ;;  %v213_v15 = vsel %vm874_vm13, %v186_v37, %v197_v4  ;;  %v214_v21 = vsel %vm866_vm11, %v184_v62, %v199_v6 }
 0x1de   :  { %v225_v42 = vmul.f32 %v773_v38, %v205_v7  ;;  %v226_v13 = vmul.f32 %v773_v38, %v206_v8  ;;  %v253_v27 = vmul.f32 %v820_v60, %v213_v15  ;;  %v254_v31 = vmul.f32 %v820_v60, %v214_v21 }
 0x1df   :  { %v342_v16 = vpop.permute.xlu0 %341 }
 0x1e0   :  { %v241_v17 = vadd.f32 %v237_v36, %v225_v42  ;;  %v242_v20 = vadd.f32 %v238_v25, %v226_v13  ;;  %v182_v39 = vpop.permute.xlu1 %181  ;;  %v345_v51 = vsel %vm183_vm9, %v338_v56, %v342_v16  ;;  %v347_v35 = vsel %vm183_vm9, %v342_v16, %v338_v56 }
 0x1e1   :  { %v389_v56 = vmul.f32 %v783_v43, %v802_v53 }
 0x1e2   :  { %v257_v11 = vadd.f32 %v253_v27, %v241_v17  ;;  %v258_v26 = vadd.f32 %v254_v31, %v242_v20  ;;  %v240_v20 = vmul.f32 %v777_v40, %v831_v2  ;;  %v239_v27 = vmul.f32 %v777_v40, %v882_v29 }
 0x1e3   :  { %v354_v57 = vpop.permute.xlu0 %353 }
 0x1e4   :  { %v357_v38 = vsel %vm196_vm10, %v350_v58, %v354_v57  ;;  %v359_v30 = vsel %vm196_vm10, %v354_v57, %v350_v58  ;;  %v195_v32 = vpop.permute.xlu1 %194  ;;  %v413_v33 = vadd.f32 %v333_v9, %v257_v11  ;;  %v414_v46 = vadd.f32 %v334_v14, %v258_v26 }
 0x1e5   :  { %v361_v60 = vsel %vm870_vm12, %v357_v38, %v347_v35  ;;  %v362_v48 = vsel %vm858_vm8, %v359_v30, %v345_v51  ;;  %v365_v52 = vsel %vm874_vm13, %v347_v35, %v357_v38  ;;  %v366_v55 = vsel %vm866_vm11, %v345_v51, %v359_v30 }
 0x1e6   :  { %v390_v58 = vmul.f32 %v783_v43, %v827_v63  ;;  %v377_v9 = vmul.f32 %v779_v41, %v361_v60  ;;  %v378_v14 = vmul.f32 %v779_v41, %v362_v48  ;;  %v405_v59 = vmul.f32 %v855_v18, %v365_v52 }
 0x1e7   :  { %v406_v61 = vmul.f32 %v855_v18, %v366_v55 }
 0x1e8   :  { %v340_v62 = vpop.permute.xlu1 %339  ;;  %v393_v37 = vadd.f32 %v389_v56, %v377_v9  ;;  %v394_v4 = vadd.f32 %v390_v58, %v378_v14 }
 0x1ea   :  { %v409_v6 = vadd.f32 %v405_v59, %v393_v37  ;;  %v410_v7 = vadd.f32 %v406_v61, %v394_v4 }
 0x1ec   :  { %v352_v8 = vpop.permute.xlu1 %351 }
 0x1f0   :  { %v178_v15 = vpop.permute.xlu1 %177 }
 0x1f1   :  { %v185_v53 = vsel %vm183_vm9, %v178_v15, %v182_v39  ;;  %v187_v43 = vsel %vm183_vm9, %v182_v39, %v178_v15 }
 0x1f4   :  { %v419_v63 = vpop.permute.xlu0 %418  ;;  %v191_v21 = vpop.permute.xlu1 %190 }
 0x1f5   :  { %v425_v41 = vadd.f32 %v419_v63, %v409_v6  ;;  %v426_v25 = vadd.f32 %v419_v63, %v410_v7  ;;  %v198_v18 = vsel %vm196_vm10, %v191_v21, %v195_v32  ;;  %v200_v36 = vsel %vm196_vm10, %v195_v32, %v191_v21 }
 0x1f6   :  { %v207_v42 = vsel %vm870_vm12, %v198_v18, %v187_v43  ;;  %v208_v13 = vsel %vm858_vm8, %v200_v36, %v185_v53  ;;  %v215_v16 = vsel %vm874_vm13, %v187_v43, %v198_v18  ;;  %v216_v17 = vsel %vm866_vm11, %v185_v53, %v200_v36 }
 0x1f7   :  { %v227_v31 = vmul.f32 %v765_v34, %v207_v42  ;;  %v228_v39 = vmul.f32 %v765_v34, %v208_v13  ;;  %v1011_v26 = vadd.f32 %v425_v41, %v413_v33  ;;  %v1013_v51 = vadd.f32 %v426_v25, %v414_v46 }
 0x1f8   :  { %v344_v11 = vpop.permute.xlu1 %343  ;;  %v255_v38 = vmul.f32 %v806_v54, %v215_v16  ;;  %v256_v30 = vmul.f32 %v806_v54, %v216_v17  ;;  %v461_v18 = vshrl.u32 %v121_v45, 7 }
 0x1f9   :  { %v243_v35 = vadd.f32 %v239_v27, %v227_v31  ;;  %v244_v57 = vadd.f32 %v240_v20, %v228_v39  ;;  %v433_v2 = vadd.f32 %v1013_v51, %v1011_v26  ;;  %v346_v29 = vsel %vm183_vm9, %v340_v62, %v344_v11 }
 0x1fa   :  { %v348_v34 = vsel %vm183_vm9, %v344_v11, %v340_v62  ;;  %v462_v16 = vsub.s32 0, %v461_v18 }
 0x1fb   :  { %v259_v32 = vadd.f32 %v255_v38, %v243_v35  ;;  %v260_v40 = vadd.f32 %v256_v30, %v244_v57  ;;  %434 = vadd.xlane.f32.xlu1 %v433_v2  ;;  %v667_v30 = vmov 10  }
 0x1fc   :  { %v356_v33 = vpop.permute.xlu1 %355  ;;  %646 = vset.pattern.permute.xlu0 %v667_v30  ;;  %647 = vset.pattern.permute.xlu1 %v667_v30 }
 0x1fd   :  { %v358_v46 = vsel %vm196_vm10, %v352_v8, %v356_v33  ;;  %v360_v60 = vsel %vm196_vm10, %v356_v33, %v352_v8  ;;  %v415_v54 = vadd.f32 %v937_v49, %v259_v32  ;;  %v416_v48 = vadd.f32 %v939_v50, %v260_v40 }
 0x1fe   :  { %v363_v52 = vsel %vm870_vm12, %v358_v46, %v348_v34  ;;  %v364_v55 = vsel %vm858_vm8, %v360_v60, %v346_v29  ;;  %v367_v56 = vsel %vm874_vm13, %v348_v34, %v358_v46  ;;  %v368_v58 = vsel %vm866_vm11, %v346_v29, %v360_v60 }
 0x1ff   :  { %v379_v9 = vmul.f32 %v785_v44, %v363_v52  ;;  %v380_v47 = vmul.f32 %v785_v44, %v364_v55  ;;  %v407_v49 = vmul.f32 %v878_v28, %v367_v56  ;;  %v408_v50 = vmul.f32 %v878_v28, %v368_v58  ;;  %v16_v44 = vld [vmem:[%s1070_s1] sm:$0x1]  ;;  %s668_s1 = smov 64  }
 0x200   :  { %v669_v34 = vmov 11  }
 0x201   :  { %v395_v23 = vadd.f32 %v845_v10, %v379_v9  ;;  %v396_v14 = vadd.f32 %v850_v12, %v380_v47 }
 0x203   :  { %v411_v19 = vadd.f32 %v407_v49, %v395_v23  ;;  %v412_v59 = vadd.f32 %v408_v50, %v396_v14 }
 0x20d   :  { %v423_v61 = vpop.permute.xlu1 %422 }
 0x20e   :  { %v427_v24 = vadd.f32 %v423_v61, %v411_v19  ;;  %v428_v62 = vadd.f32 %v423_v61, %v412_v59 }
 0x210   :  { %v431_v37 = vadd.f32 %v427_v24, %v415_v54  ;;  %v432_v22 = vadd.f32 %v428_v62, %v416_v48 }
 0x212   :  { %v436_v4 = vadd.f32 %v432_v22, %v431_v37 }
 0x214   :  { %437 = vadd.xlane.f32.xlu0 %v436_v4 }
 0x22a   :  { %455 = vrot.lane.b32.xlu0 %v16_v44, %s666_s22 }
 0x288   :  { %v435_v28 = vpop.xlane.xlu1 %434 }
 0x289   :  { %v440_v6 = vmul.f32 0.00390625, %v435_v28 }
 0x28b   :  { %v442_v12 = vmul.f32 %v440_v6, %v698_v3 }
 0x28d   :  { %v445_v15 = vsel %vm444_vm14, %v442_v12, 0.0 }
 0x2a1   :  { %v438_v10 = vpop.xlane.xlu0 %437 }
 0x2a2   :  { %v441_v7 = vmul.f32 0.00390625, %v438_v10 }
 0x2a4   :  { %v443_v8 = vmul.f32 %v441_v7, %v706_v5 }
 0x2a5   :  { %v456_v42 = vpop.permute.xlu0 %455 }
 0x2a6   :  { %v446_v53 = vsel %vm444_vm14, %v443_v8, 0.0 }
 0x2a7   :  { %v447_v43 = vadd.f32 %v446_v53, %v445_v15 }
 0x2a9   :  { %v448_v63 = vrot.slane %v447_v43, 4 }
 0x2ab   :  { %v449_v21 = vadd.f32 %v448_v63, %v447_v43 }
 0x2ad   :  { %v450_v41 = vrot.slane %v449_v21, 2 }
 0x2af   :  { %v451_v25 = vadd.f32 %v450_v41, %v449_v21 }
 0x2b1   :  { %v452_v36 = vrot.slane %v451_v25, 1 }
 0x2b3   :  { %v453_v13 = vadd.f32 %v452_v36, %v451_v25 }
 0x2b5   :  { %v458_v17 = vadd.f32 %v456_v42, %v453_v13 }
 0x2b7   :  { %v459_v20 = vmax.f32 %v458_v17, 0.0 }
 0x2b9   :  { %v463_v27 = vrot.slane %v459_v20, %v462_v16 }
 0x2bb   :  { %465 = vrot.lane.b32.xlu1 %v463_v27, %s660_s17 }
 0x32d   :  { %v466_v31 = vpop.permute.xlu1 %465 }
 0x32e   :  { %v468_v39 = vmul.f32 %v466_v31, %v698_v3  ;;  %v469_v11 = vmul.f32 %v466_v31, %v706_v5 }
 0x330   :  { %474 = vrot.lane.b32.xlu0 %v469_v11, %s666_s22  ;;  %472 = vrot.lane.b32.xlu1 %v468_v39, %s666_s22 }
 0x3a2   :  { %v475_v35 = vpop.permute.xlu0 %474  ;;  %v473_v57 = vpop.permute.xlu1 %472 }
 0x3a3   :  { %v482_v45 = vsel %vm478_vm15, %v475_v35, 0.0  ;;  %v479_v38 = vsel %vm478_vm15, %v473_v57, 0.0 }
 0x3a4   :  { %483 = vadd.xlane.f32.xlu0 %v482_v45  ;;  %480 = vadd.xlane.f32.xlu1 %v479_v38 }
 0x431   :  { %v484_v2 = vpop.xlane.xlu0 %483  ;;  %v481_v32 = vpop.xlane.xlu1 %480 }
 0x432   :  { %v486_v40 = vadd.f32 %v484_v2, %v706_v5  ;;  %v485_v29 = vadd.f32 %v481_v32, %v698_v3 }
 0x434   :  { %494 = vperm.xlu1 %647, %v486_v40   ;;  %489 = vperm.xlu0 %646, %v485_v29  }
 0x438   :  { %518 = vrot.lane.b32.xlu1 %v698_v3, %s668_s1  ;;  %649 = vset.pattern.permute.xlu0 %v669_v34 }
 0x439   :  { %648 = vset.pattern.permute.xlu1 %v669_v34 }
 0x43c   :  { %515 = vperm.xlu1 %648, %v698_v3  }
 0x4b3   :  { %v490_v33 = vpop.permute.xlu0 %489  ;;  %v495_v46 = vpop.permute.xlu1 %494 }
 0x4b4   :  { %v497_v60 = vmul.f32 %v490_v33, %v1011_v26  ;;  %v498_v54 = vmul.f32 %v490_v33, %v1013_v51  ;;  %v499_v48 = vmul.f32 %v495_v46, %v431_v37  ;;  %v500_v5 = vmul.f32 %v495_v46, %v432_v22 }
 0x4b6   :  { %v505_v52 = vmul.f32 0.01, %v497_v60  ;;  %v506_v55 = vmul.f32 0.01, %v498_v54  ;;  %v507_v56 = vmul.f32 0.01, %v499_v48 }
 0x4b7   :  { %vm502_vm0 = vcmp.gt.f32.partialorder %v498_v54, 0.0  ;;  %vm504_vm1 = vcmp.gt.f32.partialorder %v500_v5, 0.0  ;;  %v508_v58 = vmul.f32 0.01, %v500_v5  ;;  %vm501_vm2 = vcmp.gt.f32.partialorder %v497_v60, 0.0  ;;  %v519_v26 = vpop.permute.xlu1 %518 }
 0x4b8   :  { %v510_v9 = vsel %vm502_vm0, %v498_v54, %v506_v55  ;;  %vm503_vm3 = vcmp.gt.f32.partialorder %v499_v48, 0.0  ;;  %v509_v47 = vsel %vm501_vm2, %v497_v60, %v505_v52 }
 0x4b9   :  { %v512_v49 = vsel %vm504_vm1, %v500_v5, %v508_v58  ;;  %v511_v3 = vsel %vm503_vm3, %v499_v48, %v507_v56 }
 0x4ba   :  { %v604_v50 = vpack.c.bf16 %v512_v49, %v510_v9  ;;  %v606_v23 = vpack.c.bf16 %v511_v3, %v509_v47 }
 0x4bb   :  { %v516_v51 = vpop.permute.xlu1 %515 }
 0x4bc   :  { %605 = vmatprep.subr.bf16.mxu1 %v604_v50 }
 0x4bd   :  { %607 = vmatpush1.bf16.msra.mxu1 %v606_v23 }
 0x4c0   :  { %603 = vmatmul.mubr.msk.f32.vlgmr.msra.gmra.mrb[0].mxu1 %vm478_vm15, %v519_v26 }
 0x593   :  { %v588_v14 = vpop.f32.mrb[0].mxu1 }
 0x594   :  { %v589_v19 = vadd.f32 %v588_v14, %v516_v51  ;;  %v590_v59 = vpop.f32.mrb[1].mxu1 }
 0x595   :  { %v591_v61 = vadd.f32 %v590_v59, %v516_v51 }
 0x596   :  { %v593_v24 = vadd.f32 %v589_v19, %v693_v1 }
 0x597   :  { %v594_v62 = vadd.f32 %v591_v61, %v688_v0 }
 0x598   :  { %595 = vst [vmem:[%s1071_s2] sm:$0xff] %v593_v24 }
 0x599   :  { %596 = vst [vmem:[%s1071_s2 + $0x8] sm:$0xff] %v594_v62 }

</bundles_post_ra>
